<compile_context>
chip_gen: v7x
topology: tpu7x:2x2x1
jax: 0.10.0
libtpu: 0.0.40
codegen_flags: <defaults>
</compile_context>

<pallas_src>
import functools
import math

import jax
import jax.numpy as jnp
from jax import lax
from jax.experimental import pallas as pl
from jax.experimental.pallas import tpu as pltpu


def _round_up(x, m):
    return ((x + m - 1) // m) * m


def _ntxent_row_kernel(keys_ref, pos_ref, out_ref, *, tile_m, n_valid, n_pad):
    """-pos + logsumexp(off-diagonal logits), summed over one TILE_M row slab.

    keys_ref : (n_pad, d_pad)  normalized + 1/sqrt(T)-scaled reps, VMEM-resident
    pos_ref  : (tile_m, 1)     positive logits for this slab's rows (f32)
    out_ref  : (1, 8, 128)     per-slab partial loss (scalar broadcast into tile)
    """
    row0 = pl.multiple_of(pl.program_id(0) * tile_m, tile_m)

    # Query slab is a slice of the resident keys: no second HBM input, no
    # extra double-buffered (tile_m, d_pad) VMEM allocation.
    q = keys_ref[pl.ds(row0, tile_m), :]                     # (tile_m, d_pad)
    pos = pos_ref[...].astype(jnp.float32)                   # (tile_m, 1)

    # (tile_m, n_pad) logits slab on the MXU.  Cosine norm + temperature are
    # already folded into the reps.  (A pre-transposed (d_pad, n) RHS would
    # give the canonical (M,K)x(K,N) feed, but would forbid slicing the query
    # slab out of the same resident array; for typical D the CL path is
    # EUP-bound, so the transposed-RHS contraction is kept.)
    logits = lax.dot_general(
        q, keys_ref[...],
        dimension_numbers=(((1,), (1,)), ((), ())),     # contract feature dims
        preferred_element_type=jnp.float32)

    rows = row0 + lax.broadcasted_iota(jnp.int32, (tile_m, n_pad), 0)
    cols = lax.broadcasted_iota(jnp.int32, (tile_m, n_pad), 1)
    drop = rows == cols                                       # self-similarity
    if n_pad != n_valid:
        drop = drop | (cols >= n_valid)                       # zero-padded keys

    # exp(-1e30 - m) underflows to 0, so dropped entries vanish from the sum.
    masked = jnp.where(drop, jnp.float32(-1e30), logits)
    m = jnp.max(masked, axis=-1, keepdims=True)               # (tile_m, 1)
    sumexp = jnp.sum(jnp.exp(masked - m), axis=-1, keepdims=True)
    per_row = m + jnp.log(sumexp) - pos                       # (tile_m, 1)
    if n_pad != n_valid:
        per_row = jnp.where(rows[:, :1] < n_valid, per_row, 0.0)

    block_sum = jnp.sum(per_row)
    out_ref[...] = jnp.broadcast_to(block_sum.reshape(1, 1, 1), (1, 8, 128))


def _vmem_budget_bytes():
    """~75% of this generation's physical VMEM (48 MiB v7x, 96 MiB v5e/v6e)."""
    try:
        cap = int(pltpu.get_tpu_info().vmem_capacity_bytes)
    except Exception:          # non-TPU / API drift: assume smallest (v7x, 64 MiB)
        cap = 64 << 20
    return max(32 << 20, (cap * 3) // 4)


def _pick_tile_m(n, d_pad, itemsize, budget):
    """Largest row-slab height whose VMEM working set fits the budget.

    Working set = resident keys (single copy) + ~4 f32 slab-sized temporaries
    (logits / masked / exp / reductions) + the query slice + slack.  TILE_M
    only needs to be a multiple of 16 (bf16 sublanes); raggedness vs. n is
    handled by padding + in-kernel masking, so odd batch sizes no longer fall
    back to a single (2B, 2B) slab.
    """
    for t in (1024, 512, 256, 128, 64, 32, 16):
        if t > _round_up(n, 16):
            continue
        n_pad = _round_up(n, t)
        keys_bytes = n_pad * d_pad * itemsize
        work = 4 * t * n_pad * 4 + t * d_pad * itemsize + (2 << 20)
        if keys_bytes + work <= budget:
            return t
    # TODO(synk): flash-style column tiling (second "arbitrary" grid axis with
    # online max/sum-exp scratch) so the keys need not be fully VMEM-resident
    # when n*d_pad alone exceeds the budget (very large B*D on v7x).
    return 16


def ntxent_loss(zis, zjs, *, temperature=0.5, use_cosine_similarity=True,
                con_type='CL', matmul_dtype=jnp.bfloat16):
    """Pallas TPU NT-Xent loss.  zis, zjs: (B, D).  Returns scalar f32 loss."""
    assert zis.shape == zjs.shape and zis.ndim == 2
    assert temperature > 0.0
    if con_type not in ('CL', 'proposed_1', 'proposed_2', 'proposed_3'):
        raise ValueError(f"unknown con_type: {con_type}")

    batch_size, d = zis.shape
    n = 2 * batch_size

    # ---- O(N*D) prep; XLA fuses this into ~one pass over the inputs --------
    inv_sqrt_t = jnp.float32(1.0 / math.sqrt(float(temperature)))
    z_j = zjs.astype(jnp.float32)
    z_i = zis.astype(jnp.float32)
    if use_cosine_similarity:
        # torch CosineSimilarity clamps max(|x||y|, 1e-8) on the product; the
        # per-row clamp matches it except for degenerate near-zero rows.
        z_j = z_j * lax.rsqrt(jnp.maximum(
            jnp.sum(z_j * z_j, axis=-1, keepdims=True), 1e-8))
        z_i = z_i * lax.rsqrt(jnp.maximum(
            jnp.sum(z_i * z_i, axis=-1, keepdims=True), 1e-8))
    z_j = z_j * inv_sqrt_t
    z_i = z_i * inv_sqrt_t

    pos_half = jnp.sum(z_j * z_i, axis=-1)                    # (B,) positives/T

    # ---- algebraic shortcuts: no N x N work needed (review items 5 & 6) ----
    if con_type == 'proposed_3':
        # loss = -sum_k pos_k / (2B); pos is duplicated across the two halves.
        return -2.0 * jnp.sum(pos_half) / jnp.float32(n)
    if con_type == 'proposed_2':
        # sum_{j!=k} r_k.r_j - pos_k  =  r_k.(sum_j r_j) - |r_k|^2 - pos_k
        reps_f = jnp.concatenate([z_j, z_i], axis=0)           # (2B, D) f32
        keysum = jnp.sum(reps_f, axis=0)                       # (D,)
        row_dot = reps_f @ keysum                              # (2B,)
        self_sq = jnp.sum(reps_f * reps_f, axis=-1)            # (2B,)
        pos = jnp.concatenate([pos_half, pos_half])            # (2B,)
        return jnp.sum(row_dot - self_sq - pos) / jnp.float32(n)

    # ---- CL / proposed_1: row-slab softmax-CE Pallas kernel -----------------
    itemsize = jnp.dtype(matmul_dtype).itemsize
    d_pad = max(128, _round_up(d, 128))
    budget = int(_vmem_budget_bytes())
    tile_m = _pick_tile_m(n, d_pad, itemsize, budget)
    n_pad = _round_up(n, tile_m)
    num_blocks = n_pad // tile_m

    # Normalized, 1/sqrt(T)-scaled reps in the MXU dtype; feature dim padded
    # to 128 lanes and rows padded to a tile multiple (zeros are masked off).
    reps = jnp.concatenate([z_j, z_i], axis=0).astype(matmul_dtype)
    reps = jnp.pad(reps, ((0, n_pad - n), (0, d_pad - d)))
    pos = jnp.concatenate([pos_half, pos_half])[:, None]       # (2B, 1) f32
    pos = jnp.pad(pos, ((0, n_pad - n), (0, 0)))

    kernel = functools.partial(_ntxent_row_kernel, tile_m=tile_m,
                               n_valid=n, n_pad=n_pad)

    # Keys are read from HBM exactly once (single resident copy).
    cost = pl.CostEstimate(
        flops=2 * n_pad * n_pad * d_pad,
        transcendentals=n_pad * n_pad,
        bytes_accessed=(n_pad * d_pad * itemsize + n_pad * 4
                        + num_blocks * 8 * 128 * 4))

    def launch(keys_spec):
        return pl.pallas_call(
            kernel,
            out_shape=jax.ShapeDtypeStruct((num_blocks, 8, 128), jnp.float32),
            grid=(num_blocks,),
            in_specs=[
                keys_spec,                                     # resident keys
                pl.BlockSpec((tile_m, 1), lambda i: (i, 0)),   # positives slab
            ],
            out_specs=pl.BlockSpec((1, 8, 128), lambda i: (i, 0, 0)),
            compiler_params=pltpu.CompilerParams(
                dimension_semantics=("parallel",),
                vmem_limit_bytes=budget),
            cost_estimate=cost,
        )(reps, pos)

    try:
        # Preferred: whole keys array pinned in VMEM once (single buffer).
        partials = launch(pl.BlockSpec(memory_space=pltpu.MemorySpace.VMEM))
    except Exception:
        # Fallback: classic resident full-array block (pipeline-managed).
        partials = launch(pl.BlockSpec((n_pad, d_pad), lambda i: (0, 0)))

    return jnp.sum(partials[:, 0, 0]) / jnp.float32(n)


def _reference(zis, zjs, *, temperature, use_cosine_similarity, con_type):
    """Pure-JAX f32 reference mirroring the PyTorch forward exactly."""
    b = zis.shape[0]
    n = 2 * b
    reps = jnp.concatenate([zjs, zis], axis=0).astype(jnp.float32)
    sim = reps @ reps.T
    if use_cosine_similarity:
        norm = jnp.sqrt(jnp.sum(reps * reps, axis=-1, keepdims=True))
        sim = sim / jnp.maximum(norm * norm.T, 1e-8)
    logits = sim / temperature
    idx = jnp.arange(n)
    pos = logits[idx, (idx + b) % n]
    diag = idx[:, None] == idx[None, :]
    if con_type in ('CL', 'proposed_1'):
        masked = jnp.where(diag, -jnp.inf, logits)
        per_row = -pos + jax.scipy.special.logsumexp(masked, axis=-1)
    elif con_type == 'proposed_2':
        per_row = jnp.sum(jnp.where(diag, 0.0, logits), axis=-1) - pos
    else:  # proposed_3
        per_row = -pos
    return jnp.sum(per_row) / n


if __name__ == "__main__":
    key = jax.random.PRNGKey(0)
    k1, k2 = jax.random.split(key)
    batch_size, hidden = 16, 32
    zis = jax.random.normal(k1, (batch_size, hidden), dtype=jnp.float32)
    zjs = jax.random.normal(k2, (batch_size, hidden), dtype=jnp.float32)

    configs = [
        (0.5, True, 'CL'),
        (0.5, True, 'proposed_1'),
        (0.5, True, 'proposed_2'),
        (0.5, True, 'proposed_3'),
        (0.5, False, 'CL'),
    ]
    for temp, use_cos, ct in configs:
        loss = ntxent_loss(zis, zjs, temperature=temp,
                           use_cosine_similarity=use_cos, con_type=ct)
        loss = jax.block_until_ready(loss)
        ref = _reference(zis, zjs, temperature=temp,
                         use_cosine_similarity=use_cos, con_type=ct)
        # bf16 MXU inputs -> ~1e-3 relative precision on each logit.
        assert jnp.allclose(loss, ref, rtol=2e-2, atol=5e-2), \
            (ct, use_cos, float(loss), float(ref))

    # Non-divisible batch size: exercises the row/col padding + masking path.
    zis_o = jax.random.normal(k1, (13, hidden), dtype=jnp.float32)
    zjs_o = jax.random.normal(k2, (13, hidden), dtype=jnp.float32)
    loss = jax.block_until_ready(
        ntxent_loss(zis_o, zjs_o, temperature=0.5,
                    use_cosine_similarity=True, con_type='CL'))
    ref = _reference(zis_o, zjs_o, temperature=0.5,
                     use_cosine_similarity=True, con_type='CL')
    assert jnp.allclose(loss, ref, rtol=2e-2, atol=5e-2), (float(loss), float(ref))

    print("KERNEL_OK")
</pallas_src>

<mosaic_0001>
module attributes {stable_mosaic.version = 11 : i64} {
  func.func @_ntxent_row_kernel(%arg0: i32, %arg1: memref<32x128xbf16, #tpu.memory_space<vmem>>, %arg2: memref<32x1xf32, #tpu.memory_space<vmem>>, %arg3: memref<1x8x128xf32, #tpu.memory_space<vmem>>) attributes {dimension_semantics = [#tpu.dimension_semantics<parallel>], iteration_bounds = array<i64: 1>, scalar_prefetch = 0 : i64, scratch_operands = 0 : i64, tpu.core_type = #tpu.core_type<tc>, window_params = [{pipeline_mode = #tpu.pipeline_mode<synchronous>, transform_indices = @transform_0, window_bounds = array<i64: 32, 128>}, {transform_indices = @transform_1, window_bounds = array<i64: 32, 1>}, {transform_indices = @transform_2, window_bounds = array<i64: 1, 8, 128>}]} {
    %c32_i32 = arith.constant 32 : i32
    %0 = arith.muli %arg0, %c32_i32 : i32
    %1 = tpu.assume_multiple %0, 32 : i32
    %2 = arith.index_cast %1 : i32 to index
    %c0 = arith.constant 0 : index
    %3 = vector.load %arg1[%2, %c0] : memref<32x128xbf16, #tpu.memory_space<vmem>>, vector<32x128xbf16>
    %c0_0 = arith.constant 0 : index
    %c0_1 = arith.constant 0 : index
    %4 = vector.load %arg2[%c0_0, %c0_1] : memref<32x1xf32, #tpu.memory_space<vmem>>, vector<32x1xf32>
    %c0_2 = arith.constant 0 : index
    %c0_3 = arith.constant 0 : index
    %5 = vector.load %arg1[%c0_2, %c0_3] : memref<32x128xbf16, #tpu.memory_space<vmem>>, vector<32x128xbf16>
    %cst = arith.constant dense<0.000000e+00> : vector<32x32xf32>
    %6 = tpu.matmul %3, %5, %cst {dimension_numbers = #tpu.dot_dimension_numbers<[1], [1], [0], [0], [0, 0, 1, 0], [], []>} : vector<32x128xbf16>, vector<32x128xbf16>, vector<32x32xf32> -> vector<32x32xf32>
    %7 = tpu.iota {dimensions = array<i32: 0>} : vector<32x32xi32>
    %8 = vector.broadcast %1 : i32 to vector<32x32xi32>
    %9 = arith.addi %8, %7 : vector<32x32xi32>
    %10 = tpu.iota {dimensions = array<i32: 1>} : vector<32x32xi32>
    %11 = arith.cmpi eq, %9, %10 : vector<32x32xi32>
    %cst_4 = arith.constant -1.000000e+30 : f32
    %12 = vector.broadcast %cst_4 : f32 to vector<32x32xf32>
    %13 = arith.select %11, %12, %6 : vector<32x32xi1>, vector<32x32xf32>
    %cst_5 = arith.constant dense<0xFF800000> : vector<32xf32>
    %14 = vector.multi_reduction <maximumf>, %13, %cst_5 [1] : vector<32x32xf32> to vector<32xf32>
    %15 = vector.shape_cast %14 : vector<32xf32> to vector<32x1xf32>
    %16 = vector.broadcast %15 : vector<32x1xf32> to vector<32x32xf32>
    %17 = arith.subf %13, %16 : vector<32x32xf32>
    %18 = math.exp %17 : vector<32x32xf32>
    %cst_6 = arith.constant dense<0.000000e+00> : vector<32xf32>
    %19 = vector.multi_reduction <add>, %18, %cst_6 [1] : vector<32x32xf32> to vector<32xf32>
    %20 = vector.shape_cast %19 : vector<32xf32> to vector<32x1xf32>
    %21 = math.log %20 : vector<32x1xf32>
    %22 = arith.addf %15, %21 : vector<32x1xf32>
    %23 = arith.subf %22, %4 : vector<32x1xf32>
    %24 = vector.shape_cast %23 : vector<32x1xf32> to vector<1x32x1xf32>
    %cst_7 = arith.constant dense<0.000000e+00> : vector<1xf32>
    %25 = vector.multi_reduction <add>, %24, %cst_7 [1, 2] : vector<1x32x1xf32> to vector<1xf32>
    %26 = vector.shape_cast %25 : vector<1xf32> to vector<1x1x1xf32>
    %27 = vector.extract %26[0, 0, 0] : f32 from vector<1x1x1xf32>
    %28 = vector.broadcast %27 : f32 to vector<1x1x1xf32>
    %29 = vector.shape_cast %28 : vector<1x1x1xf32> to vector<1x1x1xf32>
    %30 = vector.broadcast %29 : vector<1x1x1xf32> to vector<1x8x128xf32>
    %c0_8 = arith.constant 0 : index
    %c0_9 = arith.constant 0 : index
    %c0_10 = arith.constant 0 : index
    %31 = vector.load %arg3[%c0_8, %c0_9, %c0_10] : memref<1x8x128xf32, #tpu.memory_space<vmem>>, vector<1x8x128xf32>
    tpu.vector_store %arg3[%c0_8, %c0_9, %c0_10], %30 {strides = array<i32>} : memref<1x8x128xf32, #tpu.memory_space<vmem>>, vector<1x8x128xf32>,
    return
  }
  func.func @transform_0(%arg0: i32) -> (i32, i32) {
    %c0_i32 = arith.constant 0 : i32
    %c0_i32_0 = arith.constant 0 : i32
    %c0_i32_1 = arith.constant 0 : i32
    return %c0_i32, %c0_i32_0 : i32, i32
  }
  func.func @transform_1(%arg0: i32) -> (i32, i32) {
    %c0_i32 = arith.constant 0 : i32
    %c0_i32_0 = arith.constant 0 : i32
    return %arg0, %c0_i32 : i32, i32
  }
  func.func @transform_2(%arg0: i32) -> (i32, i32, i32) {
    %c0_i32 = arith.constant 0 : i32
    %c0_i32_0 = arith.constant 0 : i32
    %c0_i32_1 = arith.constant 0 : i32
    return %arg0, %c0_i32, %c0_i32_0 : i32, i32, i32
  }
}

module attributes {stable_mosaic.version = 11 : i64} {
  func.func @_ntxent_row_kernel(%arg0: i32, %arg1: memref<32x128xbf16, #tpu.memory_space<vmem>>, %arg2: memref<32x1xf32, #tpu.memory_space<vmem>>, %arg3: memref<1x8x128xf32, #tpu.memory_space<vmem>>) attributes {dimension_semantics = [#tpu.dimension_semantics<parallel>], iteration_bounds = array<i64: 1>, scalar_prefetch = 0 : i64, scratch_operands = 0 : i64, tpu.core_type = #tpu.core_type<tc>, window_params = [{pipeline_mode = #tpu.pipeline_mode<synchronous>, transform_indices = @transform_0, window_bounds = array<i64: 32, 128>}, {transform_indices = @transform_1, window_bounds = array<i64: 32, 1>}, {transform_indices = @transform_2, window_bounds = array<i64: 1, 8, 128>}]} {
    %c32_i32 = arith.constant 32 : i32
    %0 = arith.muli %arg0, %c32_i32 : i32
    %1 = tpu.assume_multiple %0, 32 : i32
    %2 = arith.index_cast %1 : i32 to index
    %c0 = arith.constant 0 : index
    %3 = vector.load %arg1[%2, %c0] : memref<32x128xbf16, #tpu.memory_space<vmem>>, vector<32x128xbf16>
    %c0_0 = arith.constant 0 : index
    %c0_1 = arith.constant 0 : index
    %4 = vector.load %arg2[%c0_0, %c0_1] : memref<32x1xf32, #tpu.memory_space<vmem>>, vector<32x1xf32>
    %c0_2 = arith.constant 0 : index
    %c0_3 = arith.constant 0 : index
    %5 = vector.load %arg1[%c0_2, %c0_3] : memref<32x128xbf16, #tpu.memory_space<vmem>>, vector<32x128xbf16>
    %cst = arith.constant dense<0.000000e+00> : vector<32x32xf32>
    %6 = tpu.matmul %3, %5, %cst {dimension_numbers = #tpu.dot_dimension_numbers<[1], [1], [0], [0], [0, 0, 1, 0], [], []>} : vector<32x128xbf16>, vector<32x128xbf16>, vector<32x32xf32> -> vector<32x32xf32>
    %7 = tpu.iota {dimensions = array<i32: 0>} : vector<32x32xi32>
    %8 = vector.broadcast %1 : i32 to vector<32x32xi32>
    %9 = arith.addi %8, %7 : vector<32x32xi32>
    %10 = tpu.iota {dimensions = array<i32: 1>} : vector<32x32xi32>
    %11 = arith.cmpi eq, %9, %10 : vector<32x32xi32>
    %cst_4 = arith.constant -1.000000e+30 : f32
    %12 = vector.broadcast %cst_4 : f32 to vector<32x32xf32>
    %13 = arith.select %11, %12, %6 : vector<32x32xi1>, vector<32x32xf32>
    %cst_5 = arith.constant dense<0xFF800000> : vector<32xf32>
    %14 = vector.multi_reduction <maximumf>, %13, %cst_5 [1] : vector<32x32xf32> to vector<32xf32>
    %15 = vector.shape_cast %14 : vector<32xf32> to vector<32x1xf32>
    %16 = vector.broadcast %15 : vector<32x1xf32> to vector<32x32xf32>
    %17 = arith.subf %13, %16 : vector<32x32xf32>
    %18 = math.exp %17 : vector<32x32xf32>
    %cst_6 = arith.constant dense<0.000000e+00> : vector<32xf32>
    %19 = vector.multi_reduction <add>, %18, %cst_6 [1] : vector<32x32xf32> to vector<32xf32>
    %20 = vector.shape_cast %19 : vector<32xf32> to vector<32x1xf32>
    %21 = math.log %20 : vector<32x1xf32>
    %22 = arith.addf %15, %21 : vector<32x1xf32>
    %23 = arith.subf %22, %4 : vector<32x1xf32>
    %24 = vector.shape_cast %23 : vector<32x1xf32> to vector<1x32x1xf32>
    %cst_7 = arith.constant dense<0.000000e+00> : vector<1xf32>
    %25 = vector.multi_reduction <add>, %24, %cst_7 [1, 2] : vector<1x32x1xf32> to vector<1xf32>
    %26 = vector.shape_cast %25 : vector<1xf32> to vector<1x1x1xf32>
    %27 = vector.extract %26[0, 0, 0] : f32 from vector<1x1x1xf32>
    %28 = vector.broadcast %27 : f32 to vector<1x1x1xf32>
    %29 = vector.shape_cast %28 : vector<1x1x1xf32> to vector<1x1x1xf32>
    %30 = vector.broadcast %29 : vector<1x1x1xf32> to vector<1x8x128xf32>
    %c0_8 = arith.constant 0 : index
    %c0_9 = arith.constant 0 : index
    %c0_10 = arith.constant 0 : index
    %31 = vector.load %arg3[%c0_8, %c0_9, %c0_10] : memref<1x8x128xf32, #tpu.memory_space<vmem>>, vector<1x8x128xf32>
    tpu.vector_store %arg3[%c0_8, %c0_9, %c0_10], %30 {strides = array<i32>} : memref<1x8x128xf32, #tpu.memory_space<vmem>>, vector<1x8x128xf32>,
    return
  }
  func.func @transform_0(%arg0: i32) -> (i32, i32) {
    %c0_i32 = arith.constant 0 : i32
    %c0_i32_0 = arith.constant 0 : i32
    %c0_i32_1 = arith.constant 0 : i32
    return %c0_i32, %c0_i32_0 : i32, i32
  }
  func.func @transform_1(%arg0: i32) -> (i32, i32) {
    %c0_i32 = arith.constant 0 : i32
    %c0_i32_0 = arith.constant 0 : i32
    return %arg0, %c0_i32 : i32, i32
  }
  func.func @transform_2(%arg0: i32) -> (i32, i32, i32) {
    %c0_i32 = arith.constant 0 : i32
    %c0_i32_0 = arith.constant 0 : i32
    %c0_i32_1 = arith.constant 0 : i32
    return %arg0, %c0_i32, %c0_i32_0 : i32, i32, i32
  }
}

</mosaic_0001>

<bundles_post_ra>
// kernel: tpu_custom_call.1
= control target key start
LH: loop header
LB: loop body
LE: loop exit
PB: predicated region body
PF: predicated region fallthrough
CT: control target
= control target key end

     0   :  { %s334_s0 = inlined_call_operand.vmem [shape: bf16[32,128], index: 0, kind: input, shape index: {}]   ;;  %s335_s1 = inlined_call_operand.vmem [shape: f32[32,1], index: 1, kind: input, shape index: {}]   ;;  %s336_s2 = inlined_call_operand.hbm [shape: f32[1,8,128], index: 2, kind: output, shape index: {}]  }
   0x1   :  { %v230_v0 = vld [vmem:[%s334_s0] sm:$0xff]   ;;  %v231_v1 = vld [vmem:[%s334_s0 + $0x8] sm:$0xff]  }
   0x2   :  { %219 = vmatprep.subr.bf16.mxu0 %v230_v0  ;;  %v232_v2 = vld [vmem:[%s334_s0] sm:$0xff]  }
   0x3   :  { %220 = vmatpush3.bf16.xpose.msra.mxu0 %v230_v0  ;;  %223 = vmatprep.mubr.bf16.mxu0 %v232_v2 }
   0x4   :  { %221 = vmatprep.subr.bf16.mxu0 %v231_v1 }
   0x5   :  { %7 = vsyncpa [#allocation3], 0  ;;  %v233_v3 = vld [vmem:[%s334_s0 + $0x8] sm:$0xff]   ;;  %v103_v4 = vlaneseq  ;;  %vm123_vm2 = vcmask 261120   ;;  %v22_v50 = vld [vmem:[%s335_s1] sm:$0xff]  ;;  %vm176_vm5 = vcmask 7168  }
   0x6   :  { %v23_v53 = vld [vmem:[%s335_s1 + $0x8] sm:$0xff]  ;;  %v24_v57 = vld [vmem:[%s335_s1 + $0x10] sm:$0xff]  ;;  %v25_v62 = vld [vmem:[%s335_s1 + $0x18] sm:$0xff]  ;;  %s274_s1 = smov [#allocation2]  }
   0x7   :  { %v104_v5 = vshrl.u32 %v103_v4, 7  ;;  %v114_v7 = vand.u32 127, %v103_v4  ;;  %s201_s24 = sshll.u32 %s274_s1, 4  ;;  %s202_s24 = int_to_ptr.vmem [resolvable:$true] %s201_s24 }
   0x8   :  { %s250_s26 = scalar_lea.vmem %s202_s24, 128  ;;  %p255_p1 = scmp.lt.s32.totalorder %s202_s24, %s202_s24 }
   0x9   :  { %v106_v6 = vadd.s32 16, %v104_v5  ;;  %v107_v8 = vadd.s32 24, %v104_v5  ;;  %v105_v9 = vadd.s32 8, %v104_v5  ;;  %vm115_vm1 = vcmp.eq.s32.totalorder %v104_v5, %v114_v7  ;;  %p251_p0 = scmp.ne.s32.totalorder %s202_s24, %s250_s26  ;;  %p256_p2 = scmp.lt.s32.totalorder %s250_s26, %s250_s26 }
   0xb   :  { %222 = vmatpush3.bf16.xpose.msra.mxu0 %v231_v1  ;;  %vm117_vm0 = vcmp.eq.s32.totalorder %v106_v6, %v114_v7  ;;  %vm118_vm3 = vcmp.eq.s32.totalorder %v107_v8, %v114_v7  ;;  %vm116_vm4 = vcmp.eq.s32.totalorder %v105_v9, %v114_v7  ;;  %p257_p3 = por %p256_p2, %p255_p1 }
   0xd   :  { %p258_p4 = pnand %p257_p3, %p251_p0 }
  0x12   :  { %224 = vmatmul.mubr.bf16.vlgmr.msra.gmra.mrb[0].mxu0 %v233_v3 }
  0xe5   :  { %v225_v10 = vpop.f32.mrb[0].mxu0 }
  0xe6   :  { %v121_v11 = vsel %vm117_vm0, -1e+30, %v225_v10  ;;  %v88_v12 = vpop.f32.mrb[1].mxu0 }
  0xe7   :  { %v119_v13 = vsel %vm115_vm1, -1e+30, %v88_v12  ;;  %v226_v14 = vpop.f32.mrb[2].mxu0  ;;  %v130_v15 = vsel %vm123_vm2, %v121_v11, -inf }
  0xe8   :  { %v122_v16 = vsel %vm118_vm3, -1e+30, %v226_v14  ;;  %131 = vmax.xlane.f32.xlu1 %v130_v15  ;;  %v91_v17 = vpop.f32.mrb[3].mxu0  ;;  %v124_v18 = vsel %vm123_vm2, %v119_v13, -inf }
  0xe9   :  { %v120_v19 = vsel %vm116_vm4, -1e+30, %v91_v17  ;;  %125 = vmax.xlane.f32.xlu0 %v124_v18  ;;  %v133_v20 = vsel %vm123_vm2, %v122_v16, -inf }
  0xea   :  { %v127_v21 = vsel %vm123_vm2, %v120_v19, -inf }
  0xec   :  { %134 = vmax.xlane.f32.xlu1 %v133_v20 }
  0xed   :  { %128 = vmax.xlane.f32.xlu0 %v127_v21 }
 0x175   :  { %v132_v22 = vpop.xlane.xlu1 %131 }
 0x176   :  { %v138_v23 = vsub.f32 %v121_v11, %v132_v22  ;;  %v126_v24 = vpop.xlane.xlu0 %125 }
 0x177   :  { %v136_v25 = vsub.f32 %v119_v13, %v126_v24 }
 0x178   :  { %v144_v26 = vmul.f32 1.442695, %v138_v23 }
 0x179   :  { %v140_v27 = vmul.f32 1.442695, %v136_v25  ;;  %v135_v28 = vpop.xlane.xlu1 %134 }
 0x17a   :  { %v139_v29 = vsub.f32 %v122_v16, %v135_v28  ;;  %v129_v30 = vpop.xlane.xlu0 %128 }
 0x17b   :  { %234 = vpow2.f32 %v140_v27  ;;  %v137_v31 = vsub.f32 %v120_v19, %v129_v30 }
 0x17c   :  { %236 = vpow2.f32 %v144_v26  ;;  %v146_v32 = vmul.f32 1.442695, %v139_v29 }
 0x17d   :  { %v142_v33 = vmul.f32 1.442695, %v137_v31 }
 0x17f   :  { %238 = vpow2.f32 %v142_v33 }
 0x180   :  { %240 = vpow2.f32 %v146_v32 }
 0x185   :  { %v235_v34 = vpop.eup %234 }
 0x186   :  { %v148_v35 = vsel %vm123_vm2, %v235_v34, 0.0  ;;  %v237_v36 = vpop.eup %236 }
 0x187   :  { %149 = vadd.xlane.f32.xlu0 %v148_v35  ;;  %v154_v38 = vsel %vm123_vm2, %v237_v36, 0.0 }
 0x189   :  { %v239_v37 = vpop.eup %238 }
 0x18a   :  { %v151_v39 = vsel %vm123_vm2, %v239_v37, 0.0  ;;  %v241_v40 = vpop.eup %240 }
 0x18b   :  { %155 = vadd.xlane.f32.xlu0 %v154_v38  ;;  %152 = vadd.xlane.f32.xlu1 %v151_v39  ;;  %v157_v41 = vsel %vm123_vm2, %v241_v40, 0.0 }
 0x18f   :  { %158 = vadd.xlane.f32.xlu1 %v157_v41 }
 0x214   :  { %v150_v42 = vpop.xlane.xlu0 %149 }
 0x215   :  { %242 = vlog2.f32 %v150_v42 }
 0x218   :  { %v153_v43 = vpop.xlane.xlu1 %152  ;;  %v156_v44 = vpop.xlane.xlu0 %155 }
 0x219   :  { %244 = vlog2.f32 %v153_v43 }
 0x21a   :  { %246 = vlog2.f32 %v156_v44 }
 0x21c   :  { %v159_v45 = vpop.xlane.xlu1 %158 }
 0x21d   :  { %248 = vlog2.f32 %v159_v45 }
 0x21f   :  { %v243_v46 = vpop.eup %242 }
 0x220   :  { %v161_v47 = vmul.f32 0.6931472, %v243_v46 }
 0x222   :  { %v168_v48 = vadd.f32 %v161_v47, %v126_v24 }
 0x223   :  { %v245_v49 = vpop.eup %244 }
 0x224   :  { %v247_v51 = vpop.eup %246  ;;  %v163_v52 = vmul.f32 0.6931472, %v245_v49  ;;  %v172_v55 = vsub.f32 %v168_v48, %v22_v50 }
 0x225   :  { %v165_v54 = vmul.f32 0.6931472, %v247_v51 }
 0x226   :  { %v169_v56 = vadd.f32 %v163_v52, %v129_v30  ;;  %v177_v1 = vsel %vm176_vm5, %v172_v55, 0.0 }
 0x227   :  { %v249_v58 = vpop.eup %248  ;;  %v170_v59 = vadd.f32 %v165_v54, %v132_v22 }
 0x228   :  { %v173_v60 = vsub.f32 %v169_v56, %v23_v53  ;;  %v167_v61 = vmul.f32 0.6931472, %v249_v58 }
 0x229   :  { %v174_v63 = vsub.f32 %v170_v59, %v24_v57 }
 0x22a   :  { %v171_v0 = vadd.f32 %v167_v61, %v135_v28  ;;  %v178_v2 = vsel %vm176_vm5, %v173_v60, 0.0 }
 0x22b   :  { %v179_v3 = vadd.f32 %v178_v2, %v177_v1  ;;  %v180_v5 = vsel %vm176_vm5, %v174_v63, 0.0 }
 0x22c   :  { %v175_v4 = vsub.f32 %v171_v0, %v25_v62 }
 0x22d   :  { %v181_v6 = vadd.f32 %v180_v5, %v179_v3 }
 0x22e   :  { %v182_v7 = vsel %vm176_vm5, %v175_v4, 0.0 }
 0x22f   :  { %v183_v8 = vadd.f32 %v182_v7, %v181_v6 }
 0x231   :  { %184 = vadd.xlane.f32.xlu0 %v183_v8 }
 0x2be   :  { %v185_v9 = vpop.xlane.xlu0 %184 }
 0x2bf   :  { %v186_v10 = vrot.slane %v185_v9, 4 }
 0x2c1   :  { %v187_v11 = vadd.f32 %v186_v10, %v185_v9 }
 0x2c3   :  { %v188_v12 = vrot.slane %v187_v11, 2 }
 0x2c5   :  { %v189_v13 = vadd.f32 %v188_v12, %v187_v11 }
 0x2c7   :  { %v190_v14 = vrot.slane %v189_v13, 1 }
 0x2c9   :  { %v191_v15 = vadd.f32 %v190_v14, %v189_v13 }
 0x2cb   :  { %227 = vpush %v191_v15 }
 0x2fc   :  { %s228_s25 = spop %227 }
 0x2fd   :  { %v193_v16 = vstv %s228_s25 }
 0x2fe   :  { %194 = vst [vmem:[#allocation2] sm:$0xff] %v193_v16 }
 0x2ff   :  { %261 = shalt.err (!%p258_p4)
}
 0x300   :  { %s262_s29 = scalar_lea.hbm %s336_s2, 128 }
 0x301   :  { %p263_p5 = scmp.ne.s32.totalorder %s336_s2, %s262_s29  ;;  %p266_p6 = scmp.lt.u32.totalorder %s262_s29, %s336_s2 }
 0x303   :  { %p268_p7 = pnand %p266_p6, %p263_p5 }
 0x305   :  { %271 = shalt.err (!%p268_p7)
}
 0x306   :  { %204 = dma.vmem_to_hbm [thread:$0]  %s202_s24, 128, %s336_s2, [#allocation3]  }
 0x307   :  { %272 = dma.done.wait [#allocation3], 128  }
 0x308   :  { %273 = vsyncadd [#allocation3], 4294967168 }
 0x309   :  { %208 = vsyncpa [#allocation3], 1 }

// kernel: tpu_custom_call.1
= control target key start
LH: loop header
LB: loop body
LE: loop exit
PB: predicated region body
PF: predicated region fallthrough
CT: control target
= control target key end

     0   :  { %s334_s0 = inlined_call_operand.vmem [shape: bf16[32,128], index: 0, kind: input, shape index: {}]   ;;  %s335_s1 = inlined_call_operand.vmem [shape: f32[32,1], index: 1, kind: input, shape index: {}]   ;;  %s336_s2 = inlined_call_operand.hbm [shape: f32[1,8,128], index: 2, kind: output, shape index: {}]  }
   0x1   :  { %v230_v0 = vld [vmem:[%s334_s0] sm:$0xff]   ;;  %v231_v1 = vld [vmem:[%s334_s0 + $0x8] sm:$0xff]  }
   0x2   :  { %219 = vmatprep.subr.bf16.mxu0 %v230_v0  ;;  %v232_v2 = vld [vmem:[%s334_s0] sm:$0xff]  }
   0x3   :  { %220 = vmatpush3.bf16.xpose.msra.mxu0 %v230_v0  ;;  %223 = vmatprep.mubr.bf16.mxu0 %v232_v2 }
   0x4   :  { %221 = vmatprep.subr.bf16.mxu0 %v231_v1 }
   0x5   :  { %7 = vsyncpa [#allocation3], 0  ;;  %v233_v3 = vld [vmem:[%s334_s0 + $0x8] sm:$0xff]   ;;  %v103_v4 = vlaneseq  ;;  %vm123_vm2 = vcmask 261120   ;;  %v22_v50 = vld [vmem:[%s335_s1] sm:$0xff]  ;;  %vm176_vm5 = vcmask 7168  }
   0x6   :  { %v23_v53 = vld [vmem:[%s335_s1 + $0x8] sm:$0xff]  ;;  %v24_v57 = vld [vmem:[%s335_s1 + $0x10] sm:$0xff]  ;;  %v25_v62 = vld [vmem:[%s335_s1 + $0x18] sm:$0xff]  ;;  %s274_s1 = smov [#allocation2]  }
   0x7   :  { %v104_v5 = vshrl.u32 %v103_v4, 7  ;;  %v114_v7 = vand.u32 127, %v103_v4  ;;  %s201_s24 = sshll.u32 %s274_s1, 4  ;;  %s202_s24 = int_to_ptr.vmem [resolvable:$true] %s201_s24 }
   0x8   :  { %s250_s26 = scalar_lea.vmem %s202_s24, 128  ;;  %p255_p1 = scmp.lt.s32.totalorder %s202_s24, %s202_s24 }
   0x9   :  { %v106_v6 = vadd.s32 16, %v104_v5  ;;  %v107_v8 = vadd.s32 24, %v104_v5  ;;  %v105_v9 = vadd.s32 8, %v104_v5  ;;  %vm115_vm1 = vcmp.eq.s32.totalorder %v104_v5, %v114_v7  ;;  %p251_p0 = scmp.ne.s32.totalorder %s202_s24, %s250_s26  ;;  %p256_p2 = scmp.lt.s32.totalorder %s250_s26, %s250_s26 }
   0xb   :  { %222 = vmatpush3.bf16.xpose.msra.mxu0 %v231_v1  ;;  %vm117_vm0 = vcmp.eq.s32.totalorder %v106_v6, %v114_v7  ;;  %vm118_vm3 = vcmp.eq.s32.totalorder %v107_v8, %v114_v7  ;;  %vm116_vm4 = vcmp.eq.s32.totalorder %v105_v9, %v114_v7  ;;  %p257_p3 = por %p256_p2, %p255_p1 }
   0xd   :  { %p258_p4 = pnand %p257_p3, %p251_p0 }
  0x12   :  { %224 = vmatmul.mubr.bf16.vlgmr.msra.gmra.mrb[0].mxu0 %v233_v3 }
  0xe5   :  { %v225_v10 = vpop.f32.mrb[0].mxu0 }
  0xe6   :  { %v121_v11 = vsel %vm117_vm0, -1e+30, %v225_v10  ;;  %v88_v12 = vpop.f32.mrb[1].mxu0 }
  0xe7   :  { %v119_v13 = vsel %vm115_vm1, -1e+30, %v88_v12  ;;  %v226_v14 = vpop.f32.mrb[2].mxu0  ;;  %v130_v15 = vsel %vm123_vm2, %v121_v11, -inf }
  0xe8   :  { %v122_v16 = vsel %vm118_vm3, -1e+30, %v226_v14  ;;  %131 = vmax.xlane.f32.xlu1 %v130_v15  ;;  %v91_v17 = vpop.f32.mrb[3].mxu0  ;;  %v124_v18 = vsel %vm123_vm2, %v119_v13, -inf }
  0xe9   :  { %v120_v19 = vsel %vm116_vm4, -1e+30, %v91_v17  ;;  %125 = vmax.xlane.f32.xlu0 %v124_v18  ;;  %v133_v20 = vsel %vm123_vm2, %v122_v16, -inf }
  0xea   :  { %v127_v21 = vsel %vm123_vm2, %v120_v19, -inf }
  0xec   :  { %134 = vmax.xlane.f32.xlu1 %v133_v20 }
  0xed   :  { %128 = vmax.xlane.f32.xlu0 %v127_v21 }
 0x175   :  { %v132_v22 = vpop.xlane.xlu1 %131 }
 0x176   :  { %v138_v23 = vsub.f32 %v121_v11, %v132_v22  ;;  %v126_v24 = vpop.xlane.xlu0 %125 }
 0x177   :  { %v136_v25 = vsub.f32 %v119_v13, %v126_v24 }
 0x178   :  { %v144_v26 = vmul.f32 1.442695, %v138_v23 }
 0x179   :  { %v140_v27 = vmul.f32 1.442695, %v136_v25  ;;  %v135_v28 = vpop.xlane.xlu1 %134 }
 0x17a   :  { %v139_v29 = vsub.f32 %v122_v16, %v135_v28  ;;  %v129_v30 = vpop.xlane.xlu0 %128 }
 0x17b   :  { %234 = vpow2.f32 %v140_v27  ;;  %v137_v31 = vsub.f32 %v120_v19, %v129_v30 }
 0x17c   :  { %236 = vpow2.f32 %v144_v26  ;;  %v146_v32 = vmul.f32 1.442695, %v139_v29 }
 0x17d   :  { %v142_v33 = vmul.f32 1.442695, %v137_v31 }
 0x17f   :  { %238 = vpow2.f32 %v142_v33 }
 0x180   :  { %240 = vpow2.f32 %v146_v32 }
 0x185   :  { %v235_v34 = vpop.eup %234 }
 0x186   :  { %v148_v35 = vsel %vm123_vm2, %v235_v34, 0.0  ;;  %v237_v36 = vpop.eup %236 }
 0x187   :  { %149 = vadd.xlane.f32.xlu0 %v148_v35  ;;  %v154_v38 = vsel %vm123_vm2, %v237_v36, 0.0 }
 0x189   :  { %v239_v37 = vpop.eup %238 }
 0x18a   :  { %v151_v39 = vsel %vm123_vm2, %v239_v37, 0.0  ;;  %v241_v40 = vpop.eup %240 }
 0x18b   :  { %155 = vadd.xlane.f32.xlu0 %v154_v38  ;;  %152 = vadd.xlane.f32.xlu1 %v151_v39  ;;  %v157_v41 = vsel %vm123_vm2, %v241_v40, 0.0 }
 0x18f   :  { %158 = vadd.xlane.f32.xlu1 %v157_v41 }
 0x214   :  { %v150_v42 = vpop.xlane.xlu0 %149 }
 0x215   :  { %242 = vlog2.f32 %v150_v42 }
 0x218   :  { %v153_v43 = vpop.xlane.xlu1 %152  ;;  %v156_v44 = vpop.xlane.xlu0 %155 }
 0x219   :  { %244 = vlog2.f32 %v153_v43 }
 0x21a   :  { %246 = vlog2.f32 %v156_v44 }
 0x21c   :  { %v159_v45 = vpop.xlane.xlu1 %158 }
 0x21d   :  { %248 = vlog2.f32 %v159_v45 }
 0x21f   :  { %v243_v46 = vpop.eup %242 }
 0x220   :  { %v161_v47 = vmul.f32 0.6931472, %v243_v46 }
 0x222   :  { %v168_v48 = vadd.f32 %v161_v47, %v126_v24 }
 0x223   :  { %v245_v49 = vpop.eup %244 }
 0x224   :  { %v247_v51 = vpop.eup %246  ;;  %v163_v52 = vmul.f32 0.6931472, %v245_v49  ;;  %v172_v55 = vsub.f32 %v168_v48, %v22_v50 }
 0x225   :  { %v165_v54 = vmul.f32 0.6931472, %v247_v51 }
 0x226   :  { %v169_v56 = vadd.f32 %v163_v52, %v129_v30  ;;  %v177_v1 = vsel %vm176_vm5, %v172_v55, 0.0 }
 0x227   :  { %v249_v58 = vpop.eup %248  ;;  %v170_v59 = vadd.f32 %v165_v54, %v132_v22 }
 0x228   :  { %v173_v60 = vsub.f32 %v169_v56, %v23_v53  ;;  %v167_v61 = vmul.f32 0.6931472, %v249_v58 }
 0x229   :  { %v174_v63 = vsub.f32 %v170_v59, %v24_v57 }
 0x22a   :  { %v171_v0 = vadd.f32 %v167_v61, %v135_v28  ;;  %v178_v2 = vsel %vm176_vm5, %v173_v60, 0.0 }
 0x22b   :  { %v179_v3 = vadd.f32 %v178_v2, %v177_v1  ;;  %v180_v5 = vsel %vm176_vm5, %v174_v63, 0.0 }
 0x22c   :  { %v175_v4 = vsub.f32 %v171_v0, %v25_v62 }
 0x22d   :  { %v181_v6 = vadd.f32 %v180_v5, %v179_v3 }
 0x22e   :  { %v182_v7 = vsel %vm176_vm5, %v175_v4, 0.0 }
 0x22f   :  { %v183_v8 = vadd.f32 %v182_v7, %v181_v6 }
 0x231   :  { %184 = vadd.xlane.f32.xlu0 %v183_v8 }
 0x2be   :  { %v185_v9 = vpop.xlane.xlu0 %184 }
 0x2bf   :  { %v186_v10 = vrot.slane %v185_v9, 4 }
 0x2c1   :  { %v187_v11 = vadd.f32 %v186_v10, %v185_v9 }
 0x2c3   :  { %v188_v12 = vrot.slane %v187_v11, 2 }
 0x2c5   :  { %v189_v13 = vadd.f32 %v188_v12, %v187_v11 }
 0x2c7   :  { %v190_v14 = vrot.slane %v189_v13, 1 }
 0x2c9   :  { %v191_v15 = vadd.f32 %v190_v14, %v189_v13 }
 0x2cb   :  { %227 = vpush %v191_v15 }
 0x2fc   :  { %s228_s25 = spop %227 }
 0x2fd   :  { %v193_v16 = vstv %s228_s25 }
 0x2fe   :  { %194 = vst [vmem:[#allocation2] sm:$0xff] %v193_v16 }
 0x2ff   :  { %261 = shalt.err (!%p258_p4)
}
 0x300   :  { %s262_s29 = scalar_lea.hbm %s336_s2, 128 }
 0x301   :  { %p263_p5 = scmp.ne.s32.totalorder %s336_s2, %s262_s29  ;;  %p266_p6 = scmp.lt.u32.totalorder %s262_s29, %s336_s2 }
 0x303   :  { %p268_p7 = pnand %p266_p6, %p263_p5 }
 0x305   :  { %271 = shalt.err (!%p268_p7)
}
 0x306   :  { %204 = dma.vmem_to_hbm [thread:$0]  %s202_s24, 128, %s336_s2, [#allocation3]  }
 0x307   :  { %272 = dma.done.wait [#allocation3], 128  }
 0x308   :  { %273 = vsyncadd [#allocation3], 4294967168 }
 0x309   :  { %208 = vsyncpa [#allocation3], 1 }

</bundles_post_ra>
